<compile_context>
chip_gen: v6e
topology: v6e:2x2x1
jax: 0.10.0
libtpu: 0.0.40
codegen_flags: <defaults>
</compile_context>

<pallas_src>
import jax
import jax.numpy as jnp
from jax.experimental import pallas as pl
from jax.experimental.pallas import tpu as pltpu

NEG_SLOPE = 0.01  # torch.nn.LeakyReLU default negative_slope


def _leaky_relu(x):
    return jnp.where(x >= 0, x, NEG_SLOPE * x)


def _round_up(x, m):
    return ((x + m - 1) // m) * m


def _vmem_bytes_per_step(Cin, C2, N, TH, W):
    """Rough per-grid-step VMEM estimate (f32, double-buffered blocks)."""
    P = TH * W
    PRE = _round_up(W + 1, 128)
    TOT = PRE + P + W + 1
    f32 = 4
    dbuf = 2  # Pallas double-buffers every pipelined block
    blocks = (Cin * P            # x band
              + Cin * 2 * W      # halo rows
              + 2 * P            # edge masks
              + C2 * Cin + C2    # w1, b1
              + 9 * N * C2 + N   # w2, b2
              + N * P)           # output block
    scratch = C2 * TOT           # conv1-output scratch (single-buffered)
    live = (C2 + N) * P          # conv1 value + conv2 accumulator headroom
    return f32 * (dbuf * blocks + scratch + live)


def _vmem_capacity_bytes():
    try:
        return int(pltpu.get_tpu_info().vmem_capacity_bytes)
    except Exception:
        return 64 * 1024 * 1024  # conservative default (v7x per-core VMEM)


def _pick_band_rows(H, W, Cin, C2, N, vmem_budget, requested=None):
    def fits(th):
        return _vmem_bytes_per_step(Cin, C2, N, th, W) <= vmem_budget

    def lane_ok(th):
        # output/x blocks are (.., TH*W): must be 128-aligned unless full image
        return th == H or (th * W) % 128 == 0

    if requested is not None:
        if H % requested != 0 or not lane_ok(requested) or not fits(requested):
            raise ValueError(
                f"band_rows={requested} unusable: must divide H={H}, give a "
                f"128-aligned band (TH*W % 128 == 0) and fit the VMEM budget "
                f"({vmem_budget} B).")
        return requested
    if fits(H):          # whole image per grid step: fewest steps, no halo waste
        return H
    for th in sorted((d for d in range(1, H) if H % d == 0), reverse=True):
        if lane_ok(th) and fits(th):
            return th
    raise ValueError(
        f"ConvUnit Pallas kernel: no row-band size fits VMEM budget "
        f"{vmem_budget} B for H={H}, W={W}, C2={C2}. Reduce the image/band "
        f"size or raise the budget.")


def _make_kernel(C2, TH, W, n_bands):
    P = TH * W                        # output pixels per band
    PRE = _round_up(W + 1, 128)       # 128-aligned scratch offset of band rows
    BASE = PRE - W - 1                # scratch offset of the (dy,dx)=(0,0) slab
    TOT = PRE + P + W + 1             # scratch width (covers all 9 shifted reads)

    def kernel(x_ref, xh_ref, mask_ref, w1_ref, b1_ref, w2_ref, b2_ref,
               o_ref, h_ref):
        t = pl.program_id(1)

        w1 = w1_ref[...]
        b1 = b1_ref[...]

        # ---- Conv1 (1x1) + LeakyReLU, channels-major (C x pixels) -----------
        h = jnp.dot(w1, x_ref[...], preferred_element_type=jnp.float32)
        h_ref[:, PRE:PRE + P] = _leaky_relu(h + b1)       # lane-aligned store

        # conv1 on the two halo rows (row above / row below the band)
        hh = jnp.dot(w1, xh_ref[...], preferred_element_type=jnp.float32)
        hh = _leaky_relu(hh + b1)                          # (C2, 2*W)
        h_ref[:, PRE - W:PRE] = hh[:, :W]                  # top halo row
        h_ref[:, PRE + P:PRE + P + W] = hh[:, W:2 * W]     # bottom halo row

        # Zero padding of the *activated* conv1 output at the image border.
        zrow = jnp.zeros((C2, W), jnp.float32)

        @pl.when(t == 0)
        def _():
            h_ref[:, PRE - W:PRE] = zrow

        @pl.when(t == n_bands - 1)
        def _():
            h_ref[:, PRE + P:PRE + P + W] = zrow

        # Two corner columns are only ever read through a zero mask; keep
        # them finite (0 * garbage could be NaN otherwise).
        zcol = jnp.zeros((C2, 1), jnp.float32)
        h_ref[:, BASE:BASE + 1] = zcol
        h_ref[:, PRE + P + W:PRE + P + W + 1] = zcol

        # ---- Conv2 (3x3, pad=1) + LeakyReLU: 9 accumulated partial dots -----
        mask_l = mask_ref[0:1, :]      # zero where w == 0     (left pad)
        mask_r = mask_ref[1:2, :]      # zero where w == W - 1 (right pad)
        acc = None
        for dy in range(3):
            for dx in range(3):
                off = BASE + dy * W + dx
                s = h_ref[:, off:off + P]                  # (C2, P) shifted view
                if dx == 0:
                    s = s * mask_l
                elif dx == 2:
                    s = s * mask_r
                d = jnp.dot(w2_ref[3 * dy + dx], s,
                            preferred_element_type=jnp.float32)
                acc = d if acc is None else acc + d
        o_ref[...] = _leaky_relu(acc + b2_ref[...]).astype(o_ref.dtype)

    return kernel, TOT


def conv_unit_forward(x_nchw, params, band_rows=None):
    """Fused Pallas ConvUnit.forward.  x_nchw: (B, Cin, H, W) float32 -> NCHW."""
    w1, b1, w2, b2 = params                    # PyTorch-shaped parameters
    B, Cin, H, W = x_nchw.shape
    C2 = w1.shape[0]                           # 2 * N
    N = w2.shape[0]

    cap = _vmem_capacity_bytes()
    budget = int(cap * 0.6)                    # leave headroom for Mosaic internals
    TH = _pick_band_rows(H, W, Cin, C2, N, budget, band_rows)
    n_bands = H // TH
    P = TH * W

    need = _vmem_bytes_per_step(Cin, C2, N, TH, W)
    vmem_limit = min(int(cap * 0.9), max(32 * 1024 * 1024, 2 * need))

    # ---- host-side prep: all cheap / metadata-only ---------------------------
    x_flat = x_nchw.reshape(B, Cin, H * W)     # free reshape, no copy semantics

    # 2 halo input rows per band (row above, row below); clamped indices --
    # the out-of-image halos are zeroed inside the kernel at t==0 / t==last.
    t_idx = jnp.arange(n_bands)
    halo_rows = jnp.stack([jnp.clip(t_idx * TH - 1, 0, H - 1),
                           jnp.clip(t_idx * TH + TH, 0, H - 1)],
                          axis=1).reshape(-1)                  # (2*n_bands,)
    xh = jnp.take(x_nchw, halo_rows, axis=2)                   # (B, Cin, 2nb, W)
    xh = xh.reshape(B, Cin, n_bands, 2, W)
    xh = jnp.transpose(xh, (0, 2, 1, 3, 4)).reshape(B, n_bands, Cin, 2 * W)

    # {0,1} masks implementing the zero padding at the left/right image edge.
    w_pos = jnp.arange(P) % W
    edge_mask = jnp.stack([(w_pos != 0), (w_pos != W - 1)]).astype(jnp.float32)

    w1m = w1.reshape(C2, Cin)                                  # (C2, Cin)
    b1m = b1.reshape(C2, 1)
    w2m = jnp.transpose(w2, (2, 3, 0, 1)).reshape(9, N, C2)    # (dy*3+dx, n, c)
    b2m = b2.reshape(N, 1)

    kernel, TOT = _make_kernel(C2, TH, W, n_bands)

    out_flat = pl.pallas_call(
        kernel,
        out_shape=jax.ShapeDtypeStruct((B, N, H * W), x_nchw.dtype),
        grid=(B, n_bands),
        in_specs=[
            pl.BlockSpec((None, Cin, P), lambda b, t: (b, 0, t)),
            pl.BlockSpec((None, None, Cin, 2 * W), lambda b, t: (b, t, 0, 0)),
            pl.BlockSpec((2, P), lambda b, t: (0, 0)),
            pl.BlockSpec((C2, Cin), lambda b, t: (0, 0)),
            pl.BlockSpec((C2, 1), lambda b, t: (0, 0)),
            pl.BlockSpec((9, N, C2), lambda b, t: (0, 0, 0)),
            pl.BlockSpec((N, 1), lambda b, t: (0, 0)),
        ],
        out_specs=pl.BlockSpec((None, N, P), lambda b, t: (b, 0, t)),
        scratch_shapes=[pltpu.VMEM((C2, TOT), jnp.float32)],
        compiler_params=pltpu.CompilerParams(
            dimension_semantics=("parallel", "parallel"),
            vmem_limit_bytes=vmem_limit),
    )(x_flat, xh, edge_mask, w1m, b1m, w2m, b2m)

    return out_flat.reshape(B, N, H, W)        # free reshape, already NCHW


def conv_unit_reference(x, w1, b1, w2, b2):
    """Plain-JAX reference matching torch semantics (for validation)."""
    y = jax.lax.conv_general_dilated(
        x, w1, (1, 1), "VALID", dimension_numbers=("NCHW", "OIHW", "NCHW"))
    y = _leaky_relu(y + b1[None, :, None, None])
    y = jax.lax.conv_general_dilated(
        y, w2, (1, 1), "SAME", dimension_numbers=("NCHW", "OIHW", "NCHW"))
    return _leaky_relu(y + b2[None, :, None, None])


if __name__ == "__main__":
    # ConvUnit(in_channels=4, N=8) on x of shape (2, 4, 16, 16)
    B, Cin, H, W = 2, 4, 16, 16
    N = 8
    C2 = 2 * N

    key = jax.random.PRNGKey(0)
    kx, k1, k2, k3, k4 = jax.random.split(key, 5)
    x = jax.random.normal(kx, (B, Cin, H, W), jnp.float32)
    w1 = jax.random.normal(k1, (C2, Cin, 1, 1), jnp.float32) * 0.1   # Conv1.weight
    b1 = jax.random.normal(k2, (C2,), jnp.float32) * 0.1             # Conv1.bias
    w2 = jax.random.normal(k3, (N, C2, 3, 3), jnp.float32) * 0.1     # Conv2.weight
    b2 = jax.random.normal(k4, (N,), jnp.float32) * 0.1              # Conv2.bias

    # band size is auto-picked: whole image per grid step at this size
    out = conv_unit_forward(x, (w1, b1, w2, b2))
    jax.block_until_ready(out)

    ref = conv_unit_reference(x, w1, b1, w2, b2)
    assert out.shape == ref.shape == (B, N, H, W), (out.shape, ref.shape)
    max_err = float(jnp.max(jnp.abs(out - ref)))
    assert max_err < 1e-3, f"max abs err {max_err}"

    print("KERNEL_OK")
</pallas_src>

<mosaic_0001>
module attributes {stable_mosaic.version = 11 : i64} {
  func.func @kernel(%arg0: i32, %arg1: i32, %arg2: memref<1x4x256xf32, #tpu.memory_space<vmem>>, %arg3: memref<1x1x4x32xf32, #tpu.memory_space<vmem>>, %arg4: memref<2x256xf32, #tpu.memory_space<vmem>>, %arg5: memref<16x4xf32, #tpu.memory_space<vmem>>, %arg6: memref<16x1xf32, #tpu.memory_space<vmem>>, %arg7: memref<9x8x16xf32, #tpu.memory_space<vmem>>, %arg8: memref<8x1xf32, #tpu.memory_space<vmem>>, %arg9: memref<1x8x256xf32, #tpu.memory_space<vmem>>, %arg10: memref<16x401xf32, #tpu.memory_space<vmem>>) attributes {dimension_semantics = [#tpu.dimension_semantics<parallel>, #tpu.dimension_semantics<parallel>], iteration_bounds = array<i64: 2, 1>, scalar_prefetch = 0 : i64, scratch_operands = 1 : i64, tpu.core_type = #tpu.core_type<tc>, window_params = [{transform_indices = @transform_0, window_bounds = array<i64: 1, 4, 256>}, {transform_indices = @transform_1, window_bounds = array<i64: 1, 1, 4, 32>}, {pipeline_mode = #tpu.pipeline_mode<synchronous>, transform_indices = @transform_2, window_bounds = array<i64: 2, 256>}, {pipeline_mode = #tpu.pipeline_mode<synchronous>, transform_indices = @transform_3, window_bounds = array<i64: 16, 4>}, {pipeline_mode = #tpu.pipeline_mode<synchronous>, transform_indices = @transform_4, window_bounds = array<i64: 16, 1>}, {pipeline_mode = #tpu.pipeline_mode<synchronous>, transform_indices = @transform_5, window_bounds = array<i64: 9, 8, 16>}, {pipeline_mode = #tpu.pipeline_mode<synchronous>, transform_indices = @transform_6, window_bounds = array<i64: 8, 1>}, {transform_indices = @transform_7, window_bounds = array<i64: 1, 8, 256>}]} {
    %c0 = arith.constant 0 : index
    %c0_0 = arith.constant 0 : index
    %0 = vector.load %arg5[%c0, %c0_0] : memref<16x4xf32, #tpu.memory_space<vmem>>, vector<16x4xf32>
    %c0_1 = arith.constant 0 : index
    %c0_2 = arith.constant 0 : index
    %1 = vector.load %arg6[%c0_1, %c0_2] : memref<16x1xf32, #tpu.memory_space<vmem>>, vector<16x1xf32>
    %c0_3 = arith.constant 0 : index
    %c0_4 = arith.constant 0 : index
    %c0_5 = arith.constant 0 : index
    %2 = vector.load %arg2[%c0_3, %c0_4, %c0_5] : memref<1x4x256xf32, #tpu.memory_space<vmem>>, vector<1x4x256xf32>
    %3 = vector.shape_cast %2 : vector<1x4x256xf32> to vector<4x256xf32>
    %cst = arith.constant dense<0.000000e+00> : vector<16x256xf32>
    %4 = tpu.matmul %0, %3, %cst {dimension_numbers = #tpu.dot_dimension_numbers<[1], [0], [0], [1], [0, 0, 1, 1], [], []>} : vector<16x4xf32>, vector<4x256xf32>, vector<16x256xf32> -> vector<16x256xf32>
    %5 = vector.broadcast %1 : vector<16x1xf32> to vector<16x256xf32>
    %6 = arith.addf %4, %5 : vector<16x256xf32>
    %cst_6 = arith.constant 0.000000e+00 : f32
    %7 = vector.broadcast %cst_6 : f32 to vector<16x256xf32>
    %8 = arith.cmpf oge, %6, %7 : vector<16x256xf32>
    %cst_7 = arith.constant 0.00999999977 : f32
    %9 = vector.broadcast %cst_7 : f32 to vector<16x256xf32>
    %10 = arith.mulf %9, %6 : vector<16x256xf32>
    %11 = arith.select %8, %6, %10 : vector<16x256xi1>, vector<16x256xf32>
    %c0_8 = arith.constant 0 : index
    %c128 = arith.constant 128 : index
    %12 = vector.load %arg10[%c0_8, %c128] : memref<16x401xf32, #tpu.memory_space<vmem>>, vector<16x256xf32>
    tpu.vector_store %arg10[%c0_8, %c128], %11 {strides = array<i32>} : memref<16x401xf32, #tpu.memory_space<vmem>>, vector<16x256xf32>,
    %c0_9 = arith.constant 0 : index
    %c0_10 = arith.constant 0 : index
    %c0_11 = arith.constant 0 : index
    %c0_12 = arith.constant 0 : index
    %13 = vector.load %arg3[%c0_9, %c0_10, %c0_11, %c0_12] : memref<1x1x4x32xf32, #tpu.memory_space<vmem>>, vector<1x1x4x32xf32>
    %14 = vector.shape_cast %13 : vector<1x1x4x32xf32> to vector<4x32xf32>
    %cst_13 = arith.constant dense<0.000000e+00> : vector<16x32xf32>
    %15 = tpu.matmul %0, %14, %cst_13 {dimension_numbers = #tpu.dot_dimension_numbers<[1], [0], [0], [1], [0, 0, 1, 1], [], []>} : vector<16x4xf32>, vector<4x32xf32>, vector<16x32xf32> -> vector<16x32xf32>
    %16 = vector.broadcast %1 : vector<16x1xf32> to vector<16x32xf32>
    %17 = arith.addf %15, %16 : vector<16x32xf32>
    %cst_14 = arith.constant 0.000000e+00 : f32
    %18 = vector.broadcast %cst_14 : f32 to vector<16x32xf32>
    %19 = arith.cmpf oge, %17, %18 : vector<16x32xf32>
    %cst_15 = arith.constant 0.00999999977 : f32
    %20 = vector.broadcast %cst_15 : f32 to vector<16x32xf32>
    %21 = arith.mulf %20, %17 : vector<16x32xf32>
    %22 = arith.select %19, %17, %21 : vector<16x32xi1>, vector<16x32xf32>
    %23 = vector.extract_strided_slice %22 {offsets = [0, 0], sizes = [16, 16], strides = [1, 1]} : vector<16x32xf32> to vector<16x16xf32>
    %c0_16 = arith.constant 0 : index
    %c112 = arith.constant 112 : index
    %24 = vector.load %arg10[%c0_16, %c112] : memref<16x401xf32, #tpu.memory_space<vmem>>, vector<16x16xf32>
    tpu.vector_store %arg10[%c0_16, %c112], %23 {strides = array<i32>} : memref<16x401xf32, #tpu.memory_space<vmem>>, vector<16x16xf32>,
    %25 = vector.extract_strided_slice %22 {offsets = [0, 16], sizes = [16, 16], strides = [1, 1]} : vector<16x32xf32> to vector<16x16xf32>
    %c0_17 = arith.constant 0 : index
    %c384 = arith.constant 384 : index
    %26 = vector.load %arg10[%c0_17, %c384] : memref<16x401xf32, #tpu.memory_space<vmem>>, vector<16x16xf32>
    tpu.vector_store %arg10[%c0_17, %c384], %25 {strides = array<i32>} : memref<16x401xf32, #tpu.memory_space<vmem>>, vector<16x16xf32>,
    %cst_18 = arith.constant 0.000000e+00 : f32
    %27 = vector.broadcast %cst_18 : f32 to vector<16x16xf32>
    %c0_i32 = arith.constant 0 : i32
    %28 = arith.cmpi eq, %arg1, %c0_i32 : i32
    %29 = arith.extui %28 : i1 to i32
    %c0_i32_19 = arith.constant 0 : i32
    %30 = arith.cmpi ne, %29, %c0_i32_19 : i32
    scf.if %30 {
      %c0_76 = arith.constant 0 : index
      %c112_77 = arith.constant 112 : index
      %106 = vector.load %arg10[%c0_76, %c112_77] : memref<16x401xf32, #tpu.memory_space<vmem>>, vector<16x16xf32>
      tpu.vector_store %arg10[%c0_76, %c112_77], %27 {strides = array<i32>} : memref<16x401xf32, #tpu.memory_space<vmem>>, vector<16x16xf32>,
    } else {
    }
    %c0_i32_20 = arith.constant 0 : i32
    %31 = arith.cmpi eq, %arg1, %c0_i32_20 : i32
    %32 = arith.extui %31 : i1 to i32
    %c0_i32_21 = arith.constant 0 : i32
    %33 = arith.cmpi ne, %32, %c0_i32_21 : i32
    scf.if %33 {
      %c0_76 = arith.constant 0 : index
      %c384_77 = arith.constant 384 : index
      %106 = vector.load %arg10[%c0_76, %c384_77] : memref<16x401xf32, #tpu.memory_space<vmem>>, vector<16x16xf32>
      tpu.vector_store %arg10[%c0_76, %c384_77], %27 {strides = array<i32>} : memref<16x401xf32, #tpu.memory_space<vmem>>, vector<16x16xf32>,
    } else {
    }
    %cst_22 = arith.constant 0.000000e+00 : f32
    %34 = vector.broadcast %cst_22 : f32 to vector<16x1xf32>
    %c0_23 = arith.constant 0 : index
    %c111 = arith.constant 111 : index
    %35 = vector.load %arg10[%c0_23, %c111] : memref<16x401xf32, #tpu.memory_space<vmem>>, vector<16x1xf32>
    tpu.vector_store %arg10[%c0_23, %c111], %34 {strides = array<i32>} : memref<16x401xf32, #tpu.memory_space<vmem>>, vector<16x1xf32>,
    %c0_24 = arith.constant 0 : index
    %c400 = arith.constant 400 : index
    %36 = vector.load %arg10[%c0_24, %c400] : memref<16x401xf32, #tpu.memory_space<vmem>>, vector<16x1xf32>
    tpu.vector_store %arg10[%c0_24, %c400], %34 {strides = array<i32>} : memref<16x401xf32, #tpu.memory_space<vmem>>, vector<16x1xf32>,
    %c0_25 = arith.constant 0 : index
    %c0_26 = arith.constant 0 : index
    %37 = vector.load %arg4[%c0_25, %c0_26] : memref<2x256xf32, #tpu.memory_space<vmem>>, vector<1x256xf32>
    %c1 = arith.constant 1 : index
    %c0_27 = arith.constant 0 : index
    %38 = vector.load %arg4[%c1, %c0_27] : memref<2x256xf32, #tpu.memory_space<vmem>>, vector<1x256xf32>
    %c0_28 = arith.constant 0 : index
    %c111_29 = arith.constant 111 : index
    %39 = vector.load %arg10[%c0_28, %c111_29] : memref<16x401xf32, #tpu.memory_space<vmem>>, vector<16x256xf32>
    %40 = vector.broadcast %37 : vector<1x256xf32> to vector<16x256xf32>
    %41 = arith.mulf %39, %40 : vector<16x256xf32>
    %c0_30 = arith.constant 0 : index
    %c0_31 = arith.constant 0 : index
    %c0_32 = arith.constant 0 : index
    %42 = vector.load %arg7[%c0_30, %c0_31, %c0_32] : memref<9x8x16xf32, #tpu.memory_space<vmem>>, vector<1x8x16xf32>
    %43 = vector.shape_cast %42 : vector<1x8x16xf32> to vector<8x16xf32>
    %cst_33 = arith.constant dense<0.000000e+00> : vector<8x256xf32>
    %44 = tpu.matmul %43, %41, %cst_33 {dimension_numbers = #tpu.dot_dimension_numbers<[1], [0], [0], [1], [0, 0, 1, 1], [], []>} : vector<8x16xf32>, vector<16x256xf32>, vector<8x256xf32> -> vector<8x256xf32>
    %c0_34 = arith.constant 0 : index
    %c112_35 = arith.constant 112 : index
    %45 = vector.load %arg10[%c0_34, %c112_35] : memref<16x401xf32, #tpu.memory_space<vmem>>, vector<16x256xf32>
    %c1_36 = arith.constant 1 : index
    %c0_37 = arith.constant 0 : index
    %c0_38 = arith.constant 0 : index
    %46 = vector.load %arg7[%c1_36, %c0_37, %c0_38] : memref<9x8x16xf32, #tpu.memory_space<vmem>>, vector<1x8x16xf32>
    %47 = vector.shape_cast %46 : vector<1x8x16xf32> to vector<8x16xf32>
    %cst_39 = arith.constant dense<0.000000e+00> : vector<8x256xf32>
    %48 = tpu.matmul %47, %45, %cst_39 {dimension_numbers = #tpu.dot_dimension_numbers<[1], [0], [0], [1], [0, 0, 1, 1], [], []>} : vector<8x16xf32>, vector<16x256xf32>, vector<8x256xf32> -> vector<8x256xf32>
    %49 = arith.addf %44, %48 : vector<8x256xf32>
    %c0_40 = arith.constant 0 : index
    %c113 = arith.constant 113 : index
    %50 = vector.load %arg10[%c0_40, %c113] : memref<16x401xf32, #tpu.memory_space<vmem>>, vector<16x256xf32>
    %51 = vector.broadcast %38 : vector<1x256xf32> to vector<16x256xf32>
    %52 = arith.mulf %50, %51 : vector<16x256xf32>
    %c2 = arith.constant 2 : index
    %c0_41 = arith.constant 0 : index
    %c0_42 = arith.constant 0 : index
    %53 = vector.load %arg7[%c2, %c0_41, %c0_42] : memref<9x8x16xf32, #tpu.memory_space<vmem>>, vector<1x8x16xf32>
    %54 = vector.shape_cast %53 : vector<1x8x16xf32> to vector<8x16xf32>
    %cst_43 = arith.constant dense<0.000000e+00> : vector<8x256xf32>
    %55 = tpu.matmul %54, %52, %cst_43 {dimension_numbers = #tpu.dot_dimension_numbers<[1], [0], [0], [1], [0, 0, 1, 1], [], []>} : vector<8x16xf32>, vector<16x256xf32>, vector<8x256xf32> -> vector<8x256xf32>
    %56 = arith.addf %49, %55 : vector<8x256xf32>
    %c0_44 = arith.constant 0 : index
    %c127 = arith.constant 127 : index
    %57 = vector.load %arg10[%c0_44, %c127] : memref<16x401xf32, #tpu.memory_space<vmem>>, vector<16x256xf32>
    %58 = vector.broadcast %37 : vector<1x256xf32> to vector<16x256xf32>
    %59 = arith.mulf %57, %58 : vector<16x256xf32>
    %c3 = arith.constant 3 : index
    %c0_45 = arith.constant 0 : index
    %c0_46 = arith.constant 0 : index
    %60 = vector.load %arg7[%c3, %c0_45, %c0_46] : memref<9x8x16xf32, #tpu.memory_space<vmem>>, vector<1x8x16xf32>
    %61 = vector.shape_cast %60 : vector<1x8x16xf32> to vector<8x16xf32>
    %cst_47 = arith.constant dense<0.000000e+00> : vector<8x256xf32>
    %62 = tpu.matmul %61, %59, %cst_47 {dimension_numbers = #tpu.dot_dimension_numbers<[1], [0], [0], [1], [0, 0, 1, 1], [], []>} : vector<8x16xf32>, vector<16x256xf32>, vector<8x256xf32> -> vector<8x256xf32>
    %63 = arith.addf %56, %62 : vector<8x256xf32>
    %c0_48 = arith.constant 0 : index
    %c128_49 = arith.constant 128 : index
    %64 = vector.load %arg10[%c0_48, %c128_49] : memref<16x401xf32, #tpu.memory_space<vmem>>, vector<16x256xf32>
    %c4 = arith.constant 4 : index
    %c0_50 = arith.constant 0 : index
    %c0_51 = arith.constant 0 : index
    %65 = vector.load %arg7[%c4, %c0_50, %c0_51] : memref<9x8x16xf32, #tpu.memory_space<vmem>>, vector<1x8x16xf32>
    %66 = vector.shape_cast %65 : vector<1x8x16xf32> to vector<8x16xf32>
    %cst_52 = arith.constant dense<0.000000e+00> : vector<8x256xf32>
    %67 = tpu.matmul %66, %64, %cst_52 {dimension_numbers = #tpu.dot_dimension_numbers<[1], [0], [0], [1], [0, 0, 1, 1], [], []>} : vector<8x16xf32>, vector<16x256xf32>, vector<8x256xf32> -> vector<8x256xf32>
    %68 = arith.addf %63, %67 : vector<8x256xf32>
    %c0_53 = arith.constant 0 : index
    %c129 = arith.constant 129 : index
    %69 = vector.load %arg10[%c0_53, %c129] : memref<16x401xf32, #tpu.memory_space<vmem>>, vector<16x256xf32>
    %70 = vector.broadcast %38 : vector<1x256xf32> to vector<16x256xf32>
    %71 = arith.mulf %69, %70 : vector<16x256xf32>
    %c5 = arith.constant 5 : index
    %c0_54 = arith.constant 0 : index
    %c0_55 = arith.constant 0 : index
    %72 = vector.load %arg7[%c5, %c0_54, %c0_55] : memref<9x8x16xf32, #tpu.memory_space<vmem>>, vector<1x8x16xf32>
    %73 = vector.shape_cast %72 : vector<1x8x16xf32> to vector<8x16xf32>
    %cst_56 = arith.constant dense<0.000000e+00> : vector<8x256xf32>
    %74 = tpu.matmul %73, %71, %cst_56 {dimension_numbers = #tpu.dot_dimension_numbers<[1], [0], [0], [1], [0, 0, 1, 1], [], []>} : vector<8x16xf32>, vector<16x256xf32>, vector<8x256xf32> -> vector<8x256xf32>
    %75 = arith.addf %68, %74 : vector<8x256xf32>
    %c0_57 = arith.constant 0 : index
    %c143 = arith.constant 143 : index
    %76 = vector.load %arg10[%c0_57, %c143] : memref<16x401xf32, #tpu.memory_space<vmem>>, vector<16x256xf32>
    %77 = vector.broadcast %37 : vector<1x256xf32> to vector<16x256xf32>
    %78 = arith.mulf %76, %77 : vector<16x256xf32>
    %c6 = arith.constant 6 : index
    %c0_58 = arith.constant 0 : index
    %c0_59 = arith.constant 0 : index
    %79 = vector.load %arg7[%c6, %c0_58, %c0_59] : memref<9x8x16xf32, #tpu.memory_space<vmem>>, vector<1x8x16xf32>
    %80 = vector.shape_cast %79 : vector<1x8x16xf32> to vector<8x16xf32>
    %cst_60 = arith.constant dense<0.000000e+00> : vector<8x256xf32>
    %81 = tpu.matmul %80, %78, %cst_60 {dimension_numbers = #tpu.dot_dimension_numbers<[1], [0], [0], [1], [0, 0, 1, 1], [], []>} : vector<8x16xf32>, vector<16x256xf32>, vector<8x256xf32> -> vector<8x256xf32>
    %82 = arith.addf %75, %81 : vector<8x256xf32>
    %c0_61 = arith.constant 0 : index
    %c144 = arith.constant 144 : index
    %83 = vector.load %arg10[%c0_61, %c144] : memref<16x401xf32, #tpu.memory_space<vmem>>, vector<16x256xf32>
    %c7 = arith.constant 7 : index
    %c0_62 = arith.constant 0 : index
    %c0_63 = arith.constant 0 : index
    %84 = vector.load %arg7[%c7, %c0_62, %c0_63] : memref<9x8x16xf32, #tpu.memory_space<vmem>>, vector<1x8x16xf32>
    %85 = vector.shape_cast %84 : vector<1x8x16xf32> to vector<8x16xf32>
    %cst_64 = arith.constant dense<0.000000e+00> : vector<8x256xf32>
    %86 = tpu.matmul %85, %83, %cst_64 {dimension_numbers = #tpu.dot_dimension_numbers<[1], [0], [0], [1], [0, 0, 1, 1], [], []>} : vector<8x16xf32>, vector<16x256xf32>, vector<8x256xf32> -> vector<8x256xf32>
    %87 = arith.addf %82, %86 : vector<8x256xf32>
    %c0_65 = arith.constant 0 : index
    %c145 = arith.constant 145 : index
    %88 = vector.load %arg10[%c0_65, %c145] : memref<16x401xf32, #tpu.memory_space<vmem>>, vector<16x256xf32>
    %89 = vector.broadcast %38 : vector<1x256xf32> to vector<16x256xf32>
    %90 = arith.mulf %88, %89 : vector<16x256xf32>
    %c8 = arith.constant 8 : index
    %c0_66 = arith.constant 0 : index
    %c0_67 = arith.constant 0 : index
    %91 = vector.load %arg7[%c8, %c0_66, %c0_67] : memref<9x8x16xf32, #tpu.memory_space<vmem>>, vector<1x8x16xf32>
    %92 = vector.shape_cast %91 : vector<1x8x16xf32> to vector<8x16xf32>
    %cst_68 = arith.constant dense<0.000000e+00> : vector<8x256xf32>
    %93 = tpu.matmul %92, %90, %cst_68 {dimension_numbers = #tpu.dot_dimension_numbers<[1], [0], [0], [1], [0, 0, 1, 1], [], []>} : vector<8x16xf32>, vector<16x256xf32>, vector<8x256xf32> -> vector<8x256xf32>
    %94 = arith.addf %87, %93 : vector<8x256xf32>
    %c0_69 = arith.constant 0 : index
    %c0_70 = arith.constant 0 : index
    %95 = vector.load %arg8[%c0_69, %c0_70] : memref<8x1xf32, #tpu.memory_space<vmem>>, vector<8x1xf32>
    %96 = vector.broadcast %95 : vector<8x1xf32> to vector<8x256xf32>
    %97 = arith.addf %94, %96 : vector<8x256xf32>
    %cst_71 = arith.constant 0.000000e+00 : f32
    %98 = vector.broadcast %cst_71 : f32 to vector<8x256xf32>
    %99 = arith.cmpf oge, %97, %98 : vector<8x256xf32>
    %cst_72 = arith.constant 0.00999999977 : f32
    %100 = vector.broadcast %cst_72 : f32 to vector<8x256xf32>
    %101 = arith.mulf %100, %97 : vector<8x256xf32>
    %102 = arith.select %99, %97, %101 : vector<8x256xi1>, vector<8x256xf32>
    %c0_73 = arith.constant 0 : index
    %c0_74 = arith.constant 0 : index
    %c0_75 = arith.constant 0 : index
    %103 = vector.load %arg9[%c0_73, %c0_74, %c0_75] : memref<1x8x256xf32, #tpu.memory_space<vmem>>, vector<1x8x256xf32>
    %104 = vector.shape_cast %103 : vector<1x8x256xf32> to vector<8x256xf32>
    %105 = vector.shape_cast %102 : vector<8x256xf32> to vector<1x8x256xf32>
    tpu.vector_store %arg9[%c0_73, %c0_74, %c0_75], %105 {strides = array<i32>} : memref<1x8x256xf32, #tpu.memory_space<vmem>>, vector<1x8x256xf32>,
    return
  }
  func.func @transform_0(%arg0: i32, %arg1: i32) -> (i32, i32, i32) {
    %c0_i32 = arith.constant 0 : i32
    %c0_i32_0 = arith.constant 0 : i32
    return %arg0, %c0_i32, %arg1 : i32, i32, i32
  }
  func.func @transform_1(%arg0: i32, %arg1: i32) -> (i32, i32, i32, i32) {
    %c0_i32 = arith.constant 0 : i32
    %c0_i32_0 = arith.constant 0 : i32
    %c0_i32_1 = arith.constant 0 : i32
    return %arg0, %arg1, %c0_i32, %c0_i32_0 : i32, i32, i32, i32
  }
  func.func @transform_2(%arg0: i32, %arg1: i32) -> (i32, i32) {
    %c0_i32 = arith.constant 0 : i32
    %c0_i32_0 = arith.constant 0 : i32
    %c0_i32_1 = arith.constant 0 : i32
    return %c0_i32, %c0_i32_0 : i32, i32
  }
  func.func @transform_3(%arg0: i32, %arg1: i32) -> (i32, i32) {
    %c0_i32 = arith.constant 0 : i32
    %c0_i32_0 = arith.constant 0 : i32
    %c0_i32_1 = arith.constant 0 : i32
    return %c0_i32, %c0_i32_0 : i32, i32
  }
  func.func @transform_4(%arg0: i32, %arg1: i32) -> (i32, i32) {
    %c0_i32 = arith.constant 0 : i32
    %c0_i32_0 = arith.constant 0 : i32
    %c0_i32_1 = arith.constant 0 : i32
    return %c0_i32, %c0_i32_0 : i32, i32
  }
  func.func @transform_5(%arg0: i32, %arg1: i32) -> (i32, i32, i32) {
    %c0_i32 = arith.constant 0 : i32
    %c0_i32_0 = arith.constant 0 : i32
    %c0_i32_1 = arith.constant 0 : i32
    %c0_i32_2 = arith.constant 0 : i32
    return %c0_i32, %c0_i32_0, %c0_i32_1 : i32, i32, i32
  }
  func.func @transform_6(%arg0: i32, %arg1: i32) -> (i32, i32) {
    %c0_i32 = arith.constant 0 : i32
    %c0_i32_0 = arith.constant 0 : i32
    %c0_i32_1 = arith.constant 0 : i32
    return %c0_i32, %c0_i32_0 : i32, i32
  }
  func.func @transform_7(%arg0: i32, %arg1: i32) -> (i32, i32, i32) {
    %c0_i32 = arith.constant 0 : i32
    %c0_i32_0 = arith.constant 0 : i32
    return %arg0, %c0_i32, %arg1 : i32, i32, i32
  }
}

</mosaic_0001>

<bundles_post_ra>
// kernel: tpu_custom_call.1
= control target key start
LH: loop header
LB: loop body
LE: loop exit
PB: predicated region body
PF: predicated region fallthrough
CT: control target
= control target key end

     0   :  { %12 = vsyncpa [#allocation4], 0  ;;  %s2483_s0 = inlined_call_operand.vmem [shape: f32[2,4,256], index: 0, kind: input, shape index: {}]   ;;  %s2484_s1 = inlined_call_operand.vmem [shape: f32[2,1,4,32], index: 1, kind: input, shape index: {}]   ;;  %s2485_s2 = inlined_call_operand.vmem [shape: f32[2,256], index: 2, kind: input, shape index: {}]   ;;  %s2486_s3 = inlined_call_operand.vmem [shape: f32[16,4], index: 3, kind: input, shape index: {}]   ;;  %s2487_s4 = inlined_call_operand.vmem [shape: f32[16,1], index: 4, kind: input, shape index: {}]   ;;  %s2488_s5 = inlined_call_operand.hbm [shape: f32[9,8,16], index: 5, kind: input, shape index: {}]   ;;  %s2489_s6 = inlined_call_operand.vmem [shape: f32[8,1], index: 6, kind: input, shape index: {}]   ;;  %s2490_s7 = inlined_call_operand.hbm [shape: f32[2,8,256], index: 7, kind: output, shape index: {}]  }
   0x1   :  { %13 = vsyncpa [#allocation5], 0 }
   0x2   :  { %15 = vsyncpa [#allocation5 + $0x1], 0  ;;  %s2036_s24 = smov 0   ;;  %s2038_s25 = smov 0  }
   0x3   :  { %s2040_s26 = smov 0   ;;  %s2042_s27 = smov 0  }
   0x4   :  { %s2044_s28 = smov 0   ;;  %s2046_s29 = smov 0  }
   0x5 LB: > { %s1751_s30 = sadd.s32 4294967295, %s1980_s29   ;;  %s1752_s8 = sadd.s32 4294967294, %s1980_s29   ;;  %s1980_s29 = sphi %s2046_s29, %s21_s29   ;;  %s1976_s28 = sphi %s2044_s28, %s2499_s28   ;;  %s1972_s27 = sphi %s2042_s27, %s2498_s27   ;;  %s1968_s26 = sphi %s2040_s26, %s2497_s26   ;;  %s1964_s25 = sphi %s2038_s25, %s2496_s25   ;;  %s1960_s24 = sphi %s2036_s24, %s2495_s24  }
   0x6   : > { %s33_s9 = sadd.s32 1, %s1976_s28  ;;  %s203_s10 = sadd.s32 1, %s1968_s26 }
   0x7   : > { %p35_p0 = scmp.ge.s32.totalorder %s33_s9, 2  ;;  %p213_p1 = scmp.ne.s32.totalorder %s1968_s26, %s1964_s25 }
   0x8   : > { %p214_p2 = scmp.eq.s32.totalorder %s1751_s30, 1  ;;  %p219_p3 = scmp.ne.s32.totalorder %s1964_s25, %s1960_s24 }
   0x9   : > { %s2501_s9 = smov (%p35_p0, %s33_s9), 0  ;;  %p220_p5 = scmp.eq.s32.totalorder %s1752_s8, 1 }
   0xa   : > { %p2076_p4 = por %p214_p2, %p213_p1  ;;  %s198_s12 = ssub.s32 %s1976_s28, %s2501_s9 }
   0xb   : > { %p1753_p6 = scmp.ge.s32.totalorder %s1980_s29, 1  ;;  %p201_p7 = scmp.eq.s32.totalorder %s198_s12, 0 }
   0xc   : > { %p2083_p8 = por %p220_p5, %p219_p3  ;;  %p227_p9 = scmp.lt.s32.totalorder %s1980_s29, 3 }
   0xd   : > { %s2089_s14 = scalar_select %p201_p7, %s1968_s26, %s203_s10  }
   0xe   : > { %p2091_p10 = pnand %p1753_p6, %p227_p9  ;;  %p2095_p11 = scmp.eq.s32.totalorder %s1751_s30, 0 }
   0xf   : > { %s1982_s17 = smov [#allocation3]  }
  0x10   : > { %p1800_p12 = pneg %p2091_p10  ;;  %s248_s18 = sshll.u32 %s1982_s17, 4  ;;  %s249_s18 = int_to_ptr.vmem [resolvable:$true] %s248_s18 }
  0x11   : > { %s1885_s19 = scalar_lea.vmem %s249_s18, 1152  ;;  %p1893_p5 = scmp.lt.s32.totalorder %s249_s18, %s249_s18 }
  0x12   : > { %p1801_p13 = pnand %p2095_p11, %p1800_p12  ;;  %p1886_p1 = scmp.ne.s32.totalorder %s249_s18, %s1885_s19 }
  0x13   : > { %p1894_p6 = scmp.lt.s32.totalorder %s1885_s19, %s1885_s19 }
  0x14   : > { %p1876_p0 = pneg %p1801_p13 }
  0x15   : > { %p1895_p7 = por %p1894_p6, %p1893_p5 }
  0x16   : > { %p1888_p2 = pnand %p1886_p1, %p1876_p0 }
  0x18   : > { %p1889_p3 = pneg %p1888_p2 }
  0x1a   : > { %p1896_p9 = pnand %p1895_p7, %p1889_p3 }
  0x1c   : > { %1899 = shalt.err (!%p1896_p9)
}
  0x1d   : > { %s1983_s20 = smov 128   ;;  %s1984_s21 = smov 8  }
  0x1e   : > { %1803 = dma.hbm_to_vmem [thread:$0]  (!%p1801_p13), %s2488_s5, 1152, %s249_s18, [#allocation4], %s1983_s20, %s1983_s20, %s1984_s21  }
  0x1f   : > { %290 = sbr.rel (%p2091_p10) target bundleno = 748 (0x2ec), region = 48 }
  0x24   : > { %1951 = dma.done.wait (%p2095_p11), [#allocation4], 1152  }
  0x25   : > { %1953 = vsyncadd (%p2095_p11), [#allocation4], 4294966144  ;;  %p334_p12 = scmp.lt.s32.totalorder %s1972_s27, 1  ;;  %v596_v0 = vlaneseq  ;;  %v1985_v1 = vmov 0.0   ;;  %v1986_v2 = vmov 0   ;;  %vm375_vm0 = vcmask 1043456  }
  0x26   : > { %444 = vmatprep.mubr.f32.mxu0 %v1985_v1  ;;  %1872 = vset.pattern.permute.xlu0 %v1986_v2  ;;  %vm368_vm1 = vcmask 31744   ;;  %v351_v6 = vld [vmem:[%s2486_s3] sm:$0xff]  ;;  %v352_v9 = vld [vmem:[%s2486_s3 + $0x8] sm:$0xff]  ;;  %s1988_s20 = smov 113   ;;  %s1989_s21 = smov 127   ;;  %vm608_vm7 = vcmask 908288  }
  0x27   : > { %s335_s30 = scalar_select %p334_p12, %s1972_s27, 1  ;;  %v597_v3 = vshrl.u32 %v596_v0, 7  ;;  %1791 = vmatprep.mubr.msk.f32.mxu1 %vm368_vm1, %v351_v6  ;;  %v354_v10 = vld [vmem:[%s2487_s4 + $0x8] sm:$0xff]  ;;  %v586_v12 = vld [vmem:[%s2485_s2] ss:$2 sm:$0x3] }
  0x28   : > { %363 = vperm.xlu0 %1872, %v354_v10   ;;  %v1769_v13 = vld [vmem:[%s2485_s2 + $0x1] ss:$2 sm:$0x3]  ;;  %s1990_s22 = smov 1   ;;  %s1991_s23 = smov 15   ;;  %vm836_vm9 = vcmask 924672  }
  0x29   : > { %s1761_s8 = sshll.u32 %s335_s30, 2  ;;  %s1784_s10 = sshll.u32 %s335_s30, 3  ;;  %v602_v4 = vsub.s32 1, %v597_v3  ;;  %v598_v11 = vsub.s32 0, %v597_v3  ;;  %v353_v14 = vld [vmem:[%s2487_s4] sm:$0xff]  ;;  %vm956_vm10 = vcmask 1039360  }
  0x2a   : > { %s349_s17 = scalar_lea.vmem %s2484_s1, %s1761_s8  ;;  %s341_s19 = scalar_lea.vmem %s2483_s0, %s1784_s10  ;;  %vm987_vm11 = vcmask 7168   ;;  %vm867_vm12 = vcmask 121856   ;;  %vm740_vm13 = vcmask 138240   ;;  %vm566_vm14 = vcmask 1048448  }
  0x2b   : > { %v473_v5 = vld [vmem:[%s349_s17] sm:$0xf]  ;;  %v603_v15 = vrot.slane %v586_v12, %v602_v4  ;;  %v831_v16 = vrot.slane %v1769_v13, %v602_v4  ;;  %v599_v17 = vrot.slane %v586_v12, %v598_v11  ;;  %v827_v18 = vrot.slane %v1769_v13, %v598_v11  ;;  %s1992_s30 = smov 17   ;;  %s1993_s8 = smov 112  }
  0x2c   : > { %v355_v7 = vld [vmem:[%s341_s19] sm:$0xff]  ;;  %1789 = vmatprep.subr.msk.mxu1 %vm375_vm0, %v473_v5  ;;  %s1987_s19 = smov 111   ;;  %358 = vperm.xlu0 %1872, %v353_v14   ;;  %s1994_s10 = smov 16   ;;  %vm569_vm15 = vcmask 130048  }
  0x2d   : > { %v367_v8 = vcombine.high %v355_v7, %v355_v7  ;;  %1790 = vmatpush3.msk.msra.mxu1 %vm375_vm0, %v473_v5  ;;  %606 = vrot.lane.b32.xlu1 %v603_v15, %s1987_s19  ;;  %s330_s17 = sand.u32 1, %s1964_s25   ;;  %s1785_s18 = sshll.u32 %s1972_s27, 8 }
  0x2e   : > { %1792 = vmatmul.mubr.msk.f32.vlgmr.msra.gmra.mxu1 %vm368_vm1, %v352_v9  ;;  %s1758_s16 = sshll.u32 %s330_s17, 4  ;;  %s1995_s27 = smov [#allocation6]  }
  0x2f   : > { %1762 = vmatprep.subr.msk.mxu0 %vm375_vm0, %v367_v8  ;;  %715 = vmatprep.mubr.f32.mxu1 %v1985_v1 }
  0x30   : > { %1763 = vmatpush1.msk.msra.mxu0 %vm375_vm0, %v355_v7  ;;  %604 = vrot.lane.b32.xlu0 %v599_v17, %s1987_s19  ;;  %vm580_vm0 = vcmask 917368  }
  0x31   : > { %1764 = vmatmul.mubr.msk.f32.vlgmr.msra.gmra.mxu0 %vm368_vm1, %v351_v6  ;;  %834 = vrot.lane.b32.xlu1 %v831_v16, %s1988_s20 }
  0x32   : > { %450 = vmatprep.mubr.f32.mxu0 %v1985_v1 }
  0x34   : > { %832 = vrot.lane.b32.xlu0 %v827_v18, %s1988_s20 }
  0x35   : > { %1765 = vmatmul.mubr.msk.f32.gmra.mxu0 %vm368_vm1, %v352_v9  ;;  %954 = vrot.lane.b32.xlu1 %v603_v15, %s1989_s21  ;;  %vm583_vm1 = vcmask 138368  }
  0x36   : > { %816 = vmatprep.mubr.f32.mxu0 %v1985_v1 }
  0x38   : > { %952 = vrot.lane.b32.xlu0 %v599_v17, %s1989_s21 }
  0x39   : > { %1158 = vrot.lane.b32.xlu1 %v831_v16, %s1990_s22 }
  0x3c   : > { %1156 = vrot.lane.b32.xlu0 %v827_v18, %s1990_s22 }
  0x3d   : > { %1276 = vrot.lane.b32.xlu1 %v603_v15, %s1991_s23 }
  0x40   : > { %1274 = vrot.lane.b32.xlu0 %v599_v17, %s1991_s23 }
  0x41   : > { %1499 = vrot.lane.b32.xlu1 %v831_v16, %s1992_s30 }
  0x44   : > { %1497 = vrot.lane.b32.xlu0 %v827_v18, %s1992_s30 }
  0x9f   : > { %v607_v39 = vpop.permute.xlu1 %606 }
  0xa3   : > { %v364_v19 = vpop.permute.xlu0 %363  ;;  %v835_v49 = vpop.permute.xlu1 %834 }
  0xa7   : > { %v359_v21 = vpop.permute.xlu0 %358  ;;  %v955_v55 = vpop.permute.xlu1 %954 }
  0xab   : > { %v2165_v37 = vpop.permute.xlu0 %604  ;;  %v2209_v2 = vpop.permute.xlu1 %1158 }
  0xac   : > { %v609_v47 = vsel %vm608_vm7, %v2165_v37, %v607_v39 }
  0xaf   : > { %v2178_v48 = vpop.permute.xlu0 %832  ;;  %v2219_v6 = vpop.permute.xlu1 %1276 }
  0xb0   : > { %v837_v52 = vsel %vm836_vm9, %v2178_v48, %v835_v49 }
  0xb3   : > { %v2190_v53 = vpop.permute.xlu0 %952  ;;  %v2246_v17 = vpop.permute.xlu1 %1499 }
  0xb4   : > { %v957_v57 = vsel %vm956_vm10, %v2190_v53, %v955_v55 }
  0xb7   : > { %v1157_v60 = vpop.permute.xlu0 %1156 }
  0xb8   : > { %v1160_v4 = vsel %vm987_vm11, %v1157_v60, %v2209_v2 }
  0xbb   : > { %v1275_v63 = vpop.permute.xlu0 %1274 }
  0xbc   : > { %v1278_v8 = vsel %vm867_vm12, %v1275_v63, %v2219_v6 }
  0xbf   : > { %v2244_v16 = vpop.permute.xlu0 %1497 }
  0xee   : > { %v1793_v20 = vpop.f32.mrf.mxu1 }
  0xef   : > { %v549_v22 = vadd.f32 %v1793_v20, %v364_v19 }
  0xf0   : > { %v543_v24 = vpop.f32.mrf.mxu1 }
  0xf1   : > { %v446_v23 = vpop.f32.mrf.mxu0  ;;  %v555_v25 = vmul.f32 0.01, %v549_v22  ;;  %v544_v27 = vadd.f32 %v543_v24, %v359_v21  ;;  %vm553_vm2 = vcmp.ge.f32.partialorder %v549_v22, 0.0 }
  0xf2   : > { %v447_v26 = vadd.f32 %v446_v23, %v359_v21 }
  0xf3   : > { %v448_v28 = vpop.f32.mrf.mxu0  ;;  %v554_v31 = vmul.f32 0.01, %v544_v27  ;;  %v557_v32 = vsel %vm553_vm2, %v549_v22, %v555_v25  ;;  %vm552_vm4 = vcmp.ge.f32.partialorder %v544_v27, 0.0  ;;  %vm1412_vm2 = vcmask 916480  }
  0xf4   : > { %vm457_vm3 = vcmp.ge.f32.partialorder %v447_v26, 0.0  ;;  %v461_v29 = vmul.f32 0.01, %v447_v26  ;;  %v449_v30 = vadd.f32 %v448_v28, %v359_v21  ;;  %562 = vrot.lane.b32.xlu1 %v557_v32, %s1993_s8 }
  0xf5   : > { %v452_v33 = vpop.f32.mrf.mxu0  ;;  %v556_v43 = vsel %vm552_vm4, %v544_v27, %v554_v31 }
  0xf6   : > { %v2162_v34 = vsel %vm457_vm3, %v447_v26, %v461_v29  ;;  %vm458_vm5 = vcmp.ge.f32.partialorder %v449_v30, 0.0  ;;  %v462_v35 = vmul.f32 0.01, %v449_v30  ;;  %v453_v36 = vadd.f32 %v452_v33, %v364_v19 }
  0xf7   : > { %v454_v38 = vpop.f32.mrf.mxu0  ;;  %v614_v51 = vmul.f32 %v609_v47, %v2162_v34  ;;  %v842_v56 = vmul.f32 %v837_v52, %v2162_v34  ;;  %v962_v59 = vmul.f32 %v957_v57, %v2162_v34  ;;  %v1164_v61 = vmul.f32 %v1157_v60, %v2162_v34 }
  0xf8   : > { %v2167_v40 = vsel %vm458_vm5, %v449_v30, %v462_v35  ;;  %vm459_vm6 = vcmp.ge.f32.partialorder %v453_v36, 0.0  ;;  %v463_v41 = vmul.f32 0.01, %v453_v36  ;;  %v455_v42 = vadd.f32 %v454_v38, %v364_v19  ;;  %560 = vrot.lane.b32.xlu1 %v556_v43, %s1993_s8 }
  0xf9   : > { %632 = vrot.lane.b32.xlu0 %v2167_v40, %s1994_s10  ;;  %v615_v50 = vmul.f32 %v607_v39, %v2167_v40  ;;  %v843_v54 = vmul.f32 %v835_v49, %v2167_v40  ;;  %v963_v58 = vmul.f32 %v955_v55, %v2167_v40  ;;  %v1282_v0 = vmul.f32 %v1275_v63, %v2162_v34 }
  0xfa   : > { %v2171_v44 = vsel %vm459_vm6, %v453_v36, %v463_v41  ;;  %vm460_vm8 = vcmp.ge.f32.partialorder %v455_v42, 0.0  ;;  %v464_v45 = vmul.f32 0.01, %v455_v42  ;;  %v1165_v7 = vmul.f32 %v1160_v4, %v2167_v40 }
  0xfb   : > { %v1167_v62 = vmul.f32 %v1157_v60, %v2171_v44  ;;  %v1285_v3 = vmul.f32 %v1275_v63, %v2171_v44  ;;  %v1283_v10 = vmul.f32 %v1278_v8, %v2167_v40  ;;  %v617_v13 = vmul.f32 %v609_v47, %v2171_v44 }
  0xfc   : > { %v2174_v46 = vsel %vm460_vm8, %v455_v42, %v464_v45  ;;  %630 = vrot.lane.b32.xlu1 %v2162_v34, %s1994_s10  ;;  %v845_v14 = vmul.f32 %v837_v52, %v2171_v44  ;;  %v965_v15 = vmul.f32 %v957_v57, %v2171_v44  ;;  %v1501_v19 = vsel %vm740_vm13, %v2244_v16, %v2246_v17 }
  0xfd   : > { %636 = vrot.lane.b32.xlu0 %v2171_v44, %s1994_s10  ;;  %v618_v5 = vmul.f32 %v607_v39, %v2174_v46  ;;  %v846_v9 = vmul.f32 %v835_v49, %v2174_v46  ;;  %v966_v11 = vmul.f32 %v955_v55, %v2174_v46  ;;  %v1168_v12 = vmul.f32 %v1160_v4, %v2174_v46 }
  0xfe   : > { %v1286_v18 = vmul.f32 %v1278_v8, %v2174_v46  ;;  %v1509_v20 = vmul.f32 %v1501_v19, %v2174_v46  ;;  %v1506_v55 = vmul.f32 %v1501_v19, %v2167_v40  ;;  %v1505_v57 = vmul.f32 %v2244_v16, %v2162_v34  ;;  %v621_v19 = vld [vmem:[#allocation3 + $0x8] sm:$0xff] }
 0x100   : > { %730 = vrot.lane.b32.xlu1 %v614_v51, %s1992_s30 }
 0x101   : > { %732 = vrot.lane.b32.xlu0 %v615_v50, %s1992_s30 }
 0x104   : > { %857 = vrot.lane.b32.xlu1 %v842_v56, %s1991_s23 }
 0x105   : > { %859 = vrot.lane.b32.xlu0 %v843_v54, %s1991_s23 }
 0x108   : > { %977 = vrot.lane.b32.xlu1 %v962_v59, %s1990_s22 }
 0x109   : > { %979 = vrot.lane.b32.xlu0 %v963_v58, %s1990_s22  ;;  %v1508_v58 = vmul.f32 %v2244_v16, %v2171_v44 }
 0x10c   : > { %1178 = vrot.lane.b32.xlu1 %v1164_v61, %s1989_s21 }
 0x10d   : > { %1406 = vrot.lane.b32.xlu0 %v2171_v44, %s1993_s8 }
 0x110   : > { %1296 = vrot.lane.b32.xlu1 %v1282_v0, %s1988_s20 }
 0x111   : > { %1184 = vrot.lane.b32.xlu0 %v1167_v62, %s1989_s21 }
 0x114   : > { %1402 = vrot.lane.b32.xlu1 %v2167_v40, %s1993_s8 }
 0x115   : > { %1302 = vrot.lane.b32.xlu0 %v1285_v3, %s1988_s20 }
 0x118   : > { %1180 = vrot.lane.b32.xlu1 %v1165_v7, %s1989_s21 }
 0x119   : > { %738 = vrot.lane.b32.xlu0 %v618_v5, %s1992_s30 }
 0x11c   : > { %1298 = vrot.lane.b32.xlu1 %v1283_v10, %s1988_s20 }
 0x11d   : > { %865 = vrot.lane.b32.xlu0 %v846_v9, %s1991_s23 }
 0x120   : > { %638 = vrot.lane.b32.xlu1 %v2174_v46, %s1994_s10 }
 0x121   : > { %985 = vrot.lane.b32.xlu0 %v966_v11, %s1990_s22 }
 0x124   : > { %736 = vrot.lane.b32.xlu1 %v617_v13, %s1992_s30 }
 0x125   : > { %1186 = vrot.lane.b32.xlu0 %v1168_v12, %s1989_s21 }
 0x128   : > { %863 = vrot.lane.b32.xlu1 %v845_v14, %s1991_s23 }
 0x12c   : > { %983 = vrot.lane.b32.xlu1 %v965_v15, %s1990_s22 }
 0x130   : > { %1408 = vrot.lane.b32.xlu1 %v2174_v46, %s1993_s8 }
 0x134   : > { %1304 = vrot.lane.b32.xlu1 %v1286_v18, %s1988_s20 }
 0x138   : > { %1527 = vrot.lane.b32.xlu1 %v1509_v20, %s1987_s19 }
 0x166   : > { %v563_v21 = vpop.permute.xlu1 %562 }
 0x167   : > { %568 = vst.msk [vmem:[#allocation2 + $0x20] sm:$0xff] %vm566_vm14, %v563_v21 }
 0x168   : > { %571 = vst.msk [vmem:[#allocation2 + $0x38] sm:$0xff] %vm569_vm15, %v563_v21 }
 0x169   : > { %577 = vst.msk [vmem:[#allocation2 + $0x20] sm:$0xff] %vm566_vm14, %v1985_v1 }
 0x16a   : > { %579 = vst.msk [vmem:[#allocation2 + $0x38] sm:$0xff] %vm569_vm15, %v1985_v1  ;;  %v561_v23 = vpop.permute.xlu1 %560 }
 0x16b   : > { %582 = vst.msk [vmem:[#allocation2 + $0x20] sm:$0xff] %vm580_vm0, %v1985_v1  ;;  %v2261_v22 = vpop.permute.xlu0 %632 }
 0x16c   : > { %585 = vst.msk [vmem:[#allocation2 + $0x38] sm:$0xff] %vm583_vm1, %v1985_v1 }
 0x16d   : > { %567 = vst.msk [vmem:[#allocation2] sm:$0xff] %vm566_vm14, %v561_v23 }
 0x16e   : > { %570 = vst.msk [vmem:[#allocation2 + $0x18] sm:$0xff] %vm569_vm15, %v561_v23  ;;  %v2271_v25 = vpop.permute.xlu1 %630 }
 0x16f   : > { %576 = vst.msk [vmem:[#allocation2] sm:$0xff] %vm566_vm14, %v1985_v1  ;;  %v2269_v24 = vpop.permute.xlu0 %636  ;;  %v641_v16 = vsel %vm569_vm15, %v2271_v25, %v2261_v22 }
 0x170   : > { %578 = vst.msk [vmem:[#allocation2 + $0x18] sm:$0xff] %vm569_vm15, %v1985_v1 }
 0x171   : > { %581 = vst.msk [vmem:[#allocation2] sm:$0xff] %vm580_vm0, %v1985_v1 }
 0x172   : > { %584 = vst.msk [vmem:[#allocation2 + $0x18] sm:$0xff] %vm583_vm1, %v1985_v1  ;;  %v592_v26 = vld [vmem:[#allocation2 + $0x20] sm:$0xff]  ;;  %v2274_v27 = vpop.permute.xlu1 %730 }
 0x173   : > { %634 = vrot.lane.b32.xlu0 %v592_v26, %s1994_s10  ;;  %v2276_v28 = vpop.permute.xlu0 %732  ;;  %v1155_v29 = vld [vmem:[#allocation2 + $0x38] sm:$0xff]  ;;  %v616_v32 = vmul.f32 %v2165_v37, %v592_v26  ;;  %v844_v38 = vmul.f32 %v2178_v48, %v592_v26  ;;  %v964_v43 = vmul.f32 %v2190_v53, %v592_v26 }
 0x174   : > { %v1169_v33 = vmul.f32 %v2209_v2, %v1155_v29  ;;  %v742_v26 = vsel %vm740_vm13, %v2274_v27, %v2276_v28 }
 0x176   : > { %v2280_v31 = vpop.permute.xlu1 %857 }
 0x177   : > { %1410 = vrot.lane.b32.xlu0 %v1155_v29, %s1993_s8  ;;  %v2284_v35 = vpop.permute.xlu0 %859 }
 0x178   : > { %v589_v30 = vld [vmem:[#allocation2] sm:$0xff] }
 0x179   : > { %628 = vrot.lane.b32.xlu1 %v589_v30, %s1994_s10  ;;  %v613_v39 = vmul.f32 %v2165_v37, %v589_v30  ;;  %v841_v45 = vmul.f32 %v2178_v48, %v589_v30  ;;  %v1287_v37 = vmul.f32 %v2219_v6, %v1155_v29  ;;  %v961_v49 = vmul.f32 %v2190_v53, %v589_v30  ;;  %v1152_v52 = vld [vmem:[#allocation2 + $0x18] sm:$0xff]  ;;  %s1904_s10 = sshll.u32 %s1995_s27, 4  ;;  %s1905_s10 = int_to_ptr.vmem [resolvable:$false] %s1904_s10 }
 0x17a   : > { %v2288_v36 = vpop.permute.xlu1 %977  ;;  %v1510_v53 = vmul.f32 %v2246_v17, %v1155_v29  ;;  %v1166_v61 = vmul.f32 %v2209_v2, %v1152_v52  ;;  %v1284_v3 = vmul.f32 %v2219_v6, %v1152_v52  ;;  %v1507_v5 = vmul.f32 %v2246_v17, %v1152_v52  ;;  %v1615_v2 = vld [vmem:[%s2489_s6] sm:$0xff]  ;;  %s1906_s12 = scalar_lea.vmem %s1905_s10, 512 }
 0x17b   : > { %734 = vrot.lane.b32.xlu0 %v616_v32, %s1992_s30  ;;  %v2296_v42 = vpop.permute.xlu0 %979 }
 0x17d   : > { %1188 = vrot.lane.b32.xlu1 %v1169_v33, %s1989_s21  ;;  %v619_v33 = vld [vmem:[#allocation3] sm:$0xff] }
 0x17e   : > { %v2294_v41 = vpop.permute.xlu1 %1178 }
 0x17f   : > { %861 = vrot.lane.b32.xlu0 %v844_v38, %s1991_s23  ;;  %v2306_v50 = vpop.permute.xlu0 %1406  ;;  %v869_v38 = vsel %vm867_vm12, %v2280_v31, %v2284_v35  ;;  %v989_v35 = vsel %vm987_vm11, %v2288_v36, %v2296_v42  ;;  %v1073_v42 = vld [vmem:[#allocation3 + $0x20] sm:$0xff] }
 0x181   : > { %728 = vrot.lane.b32.xlu1 %v613_v39, %s1992_s30  ;;  %s1632_s30 = scalar_lea.sflag [#allocation5], %s330_s17 }
 0x182   : > { %v2302_v47 = vpop.permute.xlu1 %1296 }
 0x183   : > { %981 = vrot.lane.b32.xlu0 %v964_v43, %s1990_s22  ;;  %v2315_v48 = vpop.permute.xlu0 %1184 }
 0x185   : > { %855 = vrot.lane.b32.xlu1 %v841_v45, %s1991_s23  ;;  %s2441_s23 = scalar_lea.hbm %s2490_s7, %s1785_s18 }
 0x186   : > { %v2310_v51 = vpop.permute.xlu1 %1402 }
 0x187   : > { %1306 = vrot.lane.b32.xlu0 %v1287_v37, %s1988_s20  ;;  %v2329_v59 = vpop.permute.xlu0 %1302  ;;  %v848_v37 = vld [vmem:[#allocation3 + $0x10] sm:$0xff] }
 0x189   : > { %975 = vrot.lane.b32.xlu1 %v961_v49, %s1990_s22 }
 0x18a   : > { %v2317_v54 = vpop.permute.xlu1 %1180 }
 0x18b   : > { %1404 = vrot.lane.b32.xlu0 %v1152_v52, %s1993_s8  ;;  %v739_v63 = vpop.permute.xlu0 %738 }
 0x18d   : > { %1400 = vrot.lane.b32.xlu1 %v2162_v34, %s1993_s8 }
 0x18e   : > { %v2323_v56 = vpop.permute.xlu1 %1298 }
 0x18f   : > { %1529 = vrot.lane.b32.xlu0 %v1510_v53, %s1987_s19  ;;  %v866_v9 = vpop.permute.xlu0 %865 }
 0x191   : > { %1521 = vrot.lane.b32.xlu1 %v1506_v55, %s1987_s19  ;;  %v968_v55 = vld [vmem:[#allocation3 + $0x18] sm:$0xff] }
 0x192   : > { %v639_v60 = vpop.permute.xlu1 %638 }
 0x193   : > { %1525 = vrot.lane.b32.xlu0 %v1508_v58, %s1987_s19  ;;  %v643_v62 = vsel %vm569_vm15, %v2269_v24, %v639_v60  ;;  %v986_v6 = vpop.permute.xlu0 %985 }
 0x194   : > { %679 = vmatprep.subr.mxu1 %v643_v62  ;;  %v1171_v62 = vld [vmem:[#allocation3 + $0x28] sm:$0xff] }
 0x195   : > { %1519 = vrot.lane.b32.xlu1 %v1505_v57, %s1987_s19 }
 0x196   : > { %v737_v0 = vpop.permute.xlu1 %736 }
 0x197   : > { %1182 = vrot.lane.b32.xlu0 %v1166_v61, %s1989_s21  ;;  %v744_v4 = vsel %vm740_vm13, %v737_v0, %v739_v63  ;;  %v1187_v12 = vpop.permute.xlu0 %1186 }
 0x198   : > { %780 = vmatprep.subr.mxu0 %v744_v4 }
 0x19a   : > { %v864_v7 = vpop.permute.xlu1 %863 }
 0x19b   : > { %1300 = vrot.lane.b32.xlu0 %v1284_v3, %s1988_s20  ;;  %v871_v21 = vsel %vm867_vm12, %v864_v7, %v866_v9 }
 0x19e   : > { %v984_v8 = vpop.permute.xlu1 %983 }
 0x19f   : > { %1523 = vrot.lane.b32.xlu0 %v1507_v5, %s1987_s19  ;;  %v991_v39 = vsel %vm987_vm11, %v984_v8, %v986_v6  ;;  %v1308_v5 = vsel %vm836_vm9, %v2302_v47, %v2323_v56  ;;  %s332_s19 = scalar_lea.vmem [#allocation6], %s1758_s16 }
 0x1a0   : > { %s1648_s20 = sshll.u32 %s332_s19, 4  ;;  %s1649_s20 = int_to_ptr.vmem [resolvable:$true] %s1648_s20 }
 0x1a1   : > { %s1900_s8 = scalar_lea.vmem %s1649_s20, 256  ;;  %p1907_p0 = scmp.lt.s32.totalorder %s1649_s20, %s1905_s10 }
 0x1a2   : > { %v2345_v10 = vpop.permute.xlu1 %1408  ;;  %p1901_p10 = scmp.ne.s32.totalorder %s1649_s20, %s1900_s8  ;;  %p1908_p1 = scmp.lt.s32.totalorder %s1906_s12, %s1900_s8 }
 0x1a3   : > { %1618 = vperm.xlu0 %1872, %v1615_v2   ;;  %v1393_v2 = vld [vmem:[#allocation3 + $0x38] sm:$0xff] }
 0x1a4   : > { %p1902_p11 = pnand %p1901_p10, %p2076_p4  ;;  %p1909_p2 = por %p1908_p1, %p1907_p0 }
 0x1a6   : > { %v2347_v11 = vpop.permute.xlu1 %1304  ;;  %p1903_p13 = pneg %p1902_p11 }
 0x1a7   : > { %v1310_v57 = vsel %vm836_vm9, %v2329_v59, %v2347_v11  ;;  %v1190_v59 = vsel %vm956_vm10, %v2294_v41, %v2317_v54 }
 0x1a8   : > { %p1910_p3 = pnand %p1909_p2, %p1903_p13 }
 0x1aa   : > { %v2349_v13 = vpop.permute.xlu1 %1527 }
 0x1e5   : > { %v635_v14 = vpop.permute.xlu0 %634 }
 0x1e6   : > { %v642_v15 = vsel %vm569_vm15, %v635_v14, %v2269_v24 }
 0x1e7   : > { %680 = vmatpush1.msra.mxu1 %v642_v15 }
 0x1e8   : > { %681 = vmatprep.subr.mxu1 %v641_v16 }
 0x1e9   : > { %v2356_v17 = vpop.permute.xlu0 %1410 }
 0x1ea   : > { %v1416_v63 = vsel %vm1412_vm2, %v2345_v10, %v2356_v17 }
 0x1eb   : > { %v629_v18 = vpop.permute.xlu1 %628 }
 0x1ec   : > { %v640_v20 = vsel %vm569_vm15, %v629_v18, %v2271_v25 }
 0x1ed   : > { %682 = vmatpush1.msra.mxu1 %v640_v20  ;;  %v735_v23 = vpop.permute.xlu0 %734 }
 0x1ee   : > { %907 = vmatprep.subr.mxu1 %v871_v21  ;;  %1770 = vmatmul.mubr.msk.f32.vlgmr.msra.gmra.mxu1 %vm569_vm15, %v621_v19  ;;  %v743_v22 = vsel %vm740_vm13, %v735_v23, %v737_v0  ;;  %v1415_v0 = vsel %vm1412_vm2, %v2306_v50, %v2345_v10 }
 0x1ef   : > { %v1189_v24 = vpop.permute.xlu1 %1188  ;;  %943 = vmatprep.mubr.f32.mxu1 %v1985_v1  ;;  %781 = vmatpush1.msra.mxu0 %v743_v22 }
 0x1f0   : > { %782 = vmatprep.subr.mxu0 %v742_v26 }
 0x1f1   : > { %v862_v29 = vpop.permute.xlu0 %861 }
 0x1f2   : > { %v870_v30 = vsel %vm867_vm12, %v862_v29, %v864_v7 }
 0x1f3   : > { %v729_v25 = vpop.permute.xlu1 %728  ;;  %908 = vmatpush1.msra.mxu1 %v870_v30 }
 0x1f4   : > { %v741_v32 = vsel %vm740_vm13, %v729_v25, %v2274_v27  ;;  %909 = vmatprep.subr.mxu1 %v869_v38 }
 0x1f5   : > { %783 = vmatpush1.msra.mxu0 %v741_v32  ;;  %v982_v28 = vpop.permute.xlu0 %981 }
 0x1f6   : > { %1027 = vmatprep.subr.mxu0 %v991_v39  ;;  %1771 = vmatmul.mubr.msk.f32.vlgmr.msra.gmra.mxu0 %vm569_vm15, %v619_v33  ;;  %v990_v45 = vsel %vm987_vm11, %v982_v28, %v984_v8 }
 0x1f7   : > { %v856_v43 = vpop.permute.xlu1 %855  ;;  %1063 = vmatprep.mubr.f32.mxu0 %v1985_v1  ;;  %1028 = vmatpush1.msra.mxu0 %v990_v45 }
 0x1f8   : > { %v868_v27 = vsel %vm867_vm12, %v856_v43, %v2280_v31  ;;  %1029 = vmatprep.subr.mxu0 %v989_v35 }
 0x1f9   : > { %910 = vmatpush1.msra.mxu1 %v868_v27  ;;  %v1307_v49 = vpop.permute.xlu0 %1306 }
 0x1fa   : > { %1105 = vmatprep.subr.mxu1 %v2174_v46  ;;  %1772 = vmatmul.mubr.msk.f32.vlgmr.msra.gmra.mxu1 %vm569_vm15, %v848_v37  ;;  %v1311_v53 = vsel %vm836_vm9, %v2347_v11, %v1307_v49  ;;  %v1193_v46 = vsel %vm956_vm10, %v1187_v12, %v1189_v24 }
 0x1fb   : > { %v976_v52 = vpop.permute.xlu1 %975  ;;  %1106 = vmatpush1.msra.mxu1 %v2171_v44  ;;  %1141 = vmatprep.mubr.f32.mxu1 %v1985_v1  ;;  %v1192_v44 = vsel %vm956_vm10, %v2315_v48, %v1187_v12 }
 0x1fc   : > { %v988_v31 = vsel %vm987_vm11, %v976_v52, %v2288_v36  ;;  %1107 = vmatprep.subr.mxu1 %v2167_v40 }
 0x1fd   : > { %1030 = vmatpush1.msra.mxu0 %v988_v31  ;;  %1108 = vmatpush1.msra.mxu1 %v2162_v34  ;;  %v1405_v36 = vpop.permute.xlu0 %1404 }
 0x1fe   : > { %1229 = vmatprep.subr.mxu0 %v1193_v46  ;;  %1347 = vmatprep.subr.mxu1 %v1311_v53  ;;  %v1414_v41 = vsel %vm1412_vm2, %v2310_v51, %v1405_v36 }
 0x1ff   : > { %1773 = vmatmul.mubr.msk.f32.vlgmr.msra.gmra.mxu0 %vm569_vm15, %v968_v55  ;;  %1774 = vmatmul.mubr.msk.f32.vlgmr.msra.gmra.mxu1 %vm569_vm15, %v1073_v42  ;;  %v1401_v40 = vpop.permute.xlu1 %1400 }
 0x200   : > { %1230 = vmatpush1.msra.mxu0 %v1192_v44  ;;  %1348 = vmatpush1.msra.mxu1 %v1310_v57  ;;  %v1413_v50 = vsel %vm1412_vm2, %v1401_v40, %v2310_v51  ;;  %v1512_v51 = vld [vmem:[#allocation3 + $0x40] sm:$0xff] }
 0x201   : > { %1265 = vmatprep.mubr.f32.mxu0 %v1985_v1  ;;  %1383 = vmatprep.mubr.f32.mxu1 %v1985_v1  ;;  %v1530_v34 = vpop.permute.xlu0 %1529 }
 0x202   : > { %v1534_v8 = vsel %vm608_vm7, %v2349_v13, %v1530_v34 }
 0x203   : > { %v1522_v60 = vpop.permute.xlu1 %1521 }
 0x205   : > { %v1526_v58 = vpop.permute.xlu0 %1525 }
 0x206   : > { %v1533_v9 = vsel %vm608_vm7, %v1526_v58, %v2349_v13 }
 0x207   : > { %v1520_v7 = vpop.permute.xlu1 %1519 }
 0x209   : > { %v1183_v48 = vpop.permute.xlu0 %1182 }
 0x20a   : > { %v1191_v61 = vsel %vm956_vm10, %v2317_v54, %v1183_v48  ;;  %v1289_v54 = vld [vmem:[#allocation3 + $0x30] sm:$0xff] }
 0x20b   : > { %1231 = vmatprep.subr.mxu0 %v1191_v61 }
 0x20c   : > { %1232 = vmatpush1.msra.mxu0 %v1190_v59 }
 0x20d   : > { %v1301_v3 = vpop.permute.xlu0 %1300  ;;  %1775 = vmatmul.mubr.msk.f32.vlgmr.msra.gmra.mxu0 %vm569_vm15, %v1171_v62  ;;  %1452 = vmatprep.subr.mxu0 %v1416_v63 }
 0x20e   : > { %1453 = vmatpush1.msra.mxu0 %v1415_v0  ;;  %v1309_v4 = vsel %vm836_vm9, %v2323_v56, %v1301_v3  ;;  %1488 = vmatprep.mubr.f32.mxu0 %v1985_v1  ;;  %v1531_v56 = vsel %vm608_vm7, %v1520_v7, %v1522_v60 }
 0x20f   : > { %1349 = vmatprep.subr.mxu1 %v1309_v4  ;;  %1454 = vmatprep.subr.mxu0 %v1414_v41 }
 0x210   : > { %1350 = vmatpush1.msra.mxu1 %v1308_v5  ;;  %1455 = vmatpush1.msra.mxu0 %v1413_v50 }
 0x211   : > { %v1524_v10 = vpop.permute.xlu0 %1523  ;;  %1776 = vmatmul.mubr.msk.f32.vlgmr.msra.gmra.mxu1 %vm569_vm15, %v1289_v54  ;;  %1570 = vmatprep.subr.mxu1 %v1534_v8 }
 0x212   : > { %1777 = vmatmul.mubr.msk.f32.vlgmr.msra.gmra.mxu0 %vm569_vm15, %v1393_v2  ;;  %1571 = vmatpush1.msra.mxu1 %v1533_v9  ;;  %v1532_v47 = vsel %vm608_vm7, %v1522_v60, %v1524_v10 }
 0x213   : > { %1572 = vmatprep.subr.mxu1 %v1532_v47  ;;  %1606 = vmatprep.mubr.f32.mxu1 %v1985_v1 }
 0x214   : > { %1573 = vmatpush1.msra.mxu1 %v1531_v56 }
 0x215   : > { %1778 = vmatmul.mubr.msk.f32.vlgmr.msra.gmra.mxu1 %vm569_vm15, %v1512_v51 }
 0x21e   : > { %v1619_v31 = vpop.permute.xlu0 %1618 }
 0x2ae   : > { %v717_v6 = vpop.f32.mrf.mxu1 }
 0x2b0   : > { %v719_v11 = vpop.f32.mrf.mxu1 }
 0x2b6   : > { %v818_v12 = vpop.f32.mrf.mxu0 }
 0x2b7   : > { %v819_v13 = vadd.f32 %v818_v12, %v717_v6 }
 0x2b8   : > { %v820_v14 = vpop.f32.mrf.mxu0 }
 0x2b9   : > { %v821_v16 = vadd.f32 %v820_v14, %v719_v11 }
 0x2ba   : > { %v945_v15 = vpop.f32.mrf.mxu1 }
 0x2bb   : > { %v950_v17 = vadd.f32 %v945_v15, %v819_v13 }
 0x2bc   : > { %v947_v18 = vpop.f32.mrf.mxu1 }
 0x2bd   : > { %v951_v20 = vadd.f32 %v947_v18, %v821_v16 }
 0x2bf   : > { %v1065_v19 = vpop.f32.mrf.mxu0  ;;  %v1143_v24 = vpop.f32.mrf.mxu1 }
 0x2c0   : > { %v1070_v21 = vadd.f32 %v1065_v19, %v950_v17 }
 0x2c1   : > { %v1067_v23 = vpop.f32.mrf.mxu0  ;;  %v1145_v26 = vpop.f32.mrf.mxu1 }
 0x2c2   : > { %v1071_v1 = vadd.f32 %v1067_v23, %v951_v20  ;;  %v1148_v22 = vadd.f32 %v1143_v24, %v1070_v21 }
 0x2c4   : > { %v1149_v30 = vadd.f32 %v1145_v26, %v1071_v1 }
 0x2cd   : > { %v1267_v29 = vpop.f32.mrf.mxu0 }
 0x2ce   : > { %v1272_v32 = vadd.f32 %v1267_v29, %v1148_v22 }
 0x2cf   : > { %v1269_v25 = vpop.f32.mrf.mxu0 }
 0x2d0   : > { %v1273_v38 = vadd.f32 %v1269_v25, %v1149_v30 }
 0x2d1   : > { %v1385_v33 = vpop.f32.mrf.mxu1 }
 0x2d2   : > { %v1390_v39 = vadd.f32 %v1385_v33, %v1272_v32  ;;  %v1490_v28 = vpop.f32.mrf.mxu0 }
 0x2d3   : > { %v1387_v43 = vpop.f32.mrf.mxu1 }
 0x2d4   : > { %v1495_v45 = vadd.f32 %v1490_v28, %v1390_v39  ;;  %v1391_v27 = vadd.f32 %v1387_v43, %v1273_v38  ;;  %v1492_v37 = vpop.f32.mrf.mxu0 }
 0x2d5   : > { %v1608_v35 = vpop.f32.mrf.mxu1 }
 0x2d6   : > { %v1496_v49 = vadd.f32 %v1492_v37, %v1391_v27  ;;  %v1613_v52 = vadd.f32 %v1608_v35, %v1495_v45 }
 0x2d7   : > { %v1610_v53 = vpop.f32.mrf.mxu1 }
 0x2d8   : > { %v1621_v55 = vadd.f32 %v1619_v31, %v1613_v52  ;;  %v1614_v46 = vadd.f32 %v1610_v53, %v1496_v49 }
 0x2da   : > { %vm1623_vm3 = vcmp.ge.f32.partialorder %v1621_v55, 0.0  ;;  %v1625_v42 = vmul.f32 0.01, %v1621_v55  ;;  %v1622_v44 = vadd.f32 %v1619_v31, %v1614_v46 }
 0x2dc   : > { %v1627_v36 = vsel %vm1623_vm3, %v1621_v55, %v1625_v42  ;;  %vm1624_vm4 = vcmp.ge.f32.partialorder %v1622_v44, 0.0  ;;  %v1626_v57 = vmul.f32 0.01, %v1622_v44 }
 0x2dd   : > { %1629 = vst [vmem:[%s332_s19] sm:$0xff] %v1627_v36 }
 0x2de   : > { %v1628_v34 = vsel %vm1624_vm4, %v1622_v44, %v1626_v57 }
 0x2df   : > { %1630 = vst [vmem:[%s332_s19 + $0x8] sm:$0xff] %v1628_v34 }
 0x2e0   : > { %1913 = shalt.err (!%p1910_p3)
}
 0x2e1   : > { %s1914_s15 = scalar_lea.hbm %s2441_s23, 256  ;;  %s1918_s18 = scalar_lea.hbm %s2490_s7, 512 }
 0x2e2   : > { %p1915_p5 = scmp.ne.s32.totalorder %s2441_s23, %s1914_s15  ;;  %p1919_p9 = scmp.lt.s32.totalorder %s2441_s23, %s2490_s7 }
 0x2e3   : > { %p1920_p12 = scmp.lt.s32.totalorder %s1918_s18, %s1914_s15 }
 0x2e4   : > { %p1916_p6 = pnand %p1915_p5, %p2076_p4 }
 0x2e5   : > { %p1921_p10 = por %p1920_p12, %p1919_p9 }
 0x2e6   : > { %p1917_p7 = pneg %p1916_p6 }
 0x2e8   : > { %p1922_p11 = pnand %p1921_p10, %p1917_p7 }
 0x2ea   : > { %1925 = shalt.err (!%p1922_p11)
}
 0x2eb   : > { %1798 = dma.vmem_to_hbm [thread:$0]  (%p2076_p4), %s1649_s20, 256, %s2441_s23, %s1632_s30  }
 0x2ec PF: > { %p1810_p13 = scmp.ge.s32.totalorder %s1980_s29, 2  ;;  %s1660_s22 = sand.u32 1, %s1960_s24  }
 0x2ed   : > { %s1661_s8 = scalar_lea.sflag [#allocation5], %s1660_s22 }
 0x2ee   : > { %p1805_p0 = pnand %p1810_p13, %p2083_p8 }
 0x2f0   : > { %p1806_p1 = pneg %p1805_p0 }
 0x2f2   : > { %1955 = dma.done.wait (%p1806_p1), %s1661_s8, 256  }
 0x2f3   : > { %1957 = vsyncadd (%p1806_p1), %s1661_s8, 4294967040  ;;  %s21_s29 = sadd.s32 1, %s1980_s29   ;;  %s2495_s24 = smov %s1964_s25 }
 0x2f4   : > { %p18_p2 = scmp.ge.s32.totalorder %s21_s29, 4   ;;  %s2496_s25 = smov %s1968_s26 }
 0x2f5   : > { %s2497_s26 = smov %s2089_s14  ;;  %s2498_s27 = smov %s1976_s28 }
 0x2f6   : > { %s2499_s28 = smov %s2501_s9  ;;  %20 = sbr.rel (!%p18_p2) target bundleno = 5 (0x5), region = 104 }
 0x2fb   :  { %1666 = vsyncpa [#allocation4], 1 }
 0x2fc   :  { %1668 = vsyncpa [#allocation4 + $0x1], 1 }
 0x2fd   :  { %1669 = vsyncpa [#allocation5], 1 }
 0x2fe   :  { %1671 = vsyncpa [#allocation5 + $0x1], 1 }

</bundles_post_ra>
